<compile_context>
chip_gen: v7x
topology: tpu7x:2x2x1
jax: 0.10.0
libtpu: 0.0.40
codegen_flags: <defaults>
</compile_context>

<pallas_src>
import jax
import jax.numpy as jnp
from jax.experimental import pallas as pl
from jax.experimental.pallas import tpu as pltpu


def _round_up(v, m):
    return ((v + m - 1) // m) * m


def _sublane_multiple(dtype):
    itemsize = jnp.dtype(dtype).itemsize
    if itemsize >= 4:
        return 8
    if itemsize == 2:
        return 16
    return 32


def _mlp_kernel(x_ref, w1_ref, b1_ref, w2_ref, b2_ref, o_ref):
    # x_ref : (block_b, in_p)
    # w1_ref: (in_p, hid_p)    b1_ref: (1, hid_p)
    # w2_ref: (hid_p, out_p)   b2_ref: (1, out_p)
    # o_ref : (block_b, out_p)
    h = jnp.dot(x_ref[...], w1_ref[...], preferred_element_type=jnp.float32)
    h = jnp.maximum(h + b1_ref[...], 0.0)
    o = jnp.dot(h.astype(w2_ref.dtype), w2_ref[...],
                preferred_element_type=jnp.float32)
    o_ref[...] = (o + b2_ref[...]).astype(o_ref.dtype)


def feed_forward_classifier(x, w1, b1, w2, b2, *, block_b=None,
                            force_pallas=False):
    """y = relu(x @ w1 + b1) @ w2 + b2, fused in one Pallas kernel.

    x : (B, input_size)
    w1: (input_size, hidden_size),  b1: (hidden_size,)
    w2: (hidden_size, output_size), b2: (output_size,)
    """
    B, input_size = x.shape
    hidden_size = w1.shape[1]
    output_size = w2.shape[1]

    # For truly tiny problems the pallas_call launch + DMA fixed overhead
    # dominates; let XLA fuse it unless the caller forces the kernel path.
    flops = 2 * B * (input_size * hidden_size + hidden_size * output_size)
    if not force_pallas and flops < (1 << 20):
        return jnp.maximum(x @ w1 + b1, 0.0) @ w2 + b2

    itemsize = jnp.dtype(x.dtype).itemsize
    sub = _sublane_multiple(x.dtype)

    # ---- lane-dense feature dims (pad to multiples of 128) -----------------
    in_p = _round_up(input_size, 128)
    hid_p = _round_up(hidden_size, 128)
    out_p = _round_up(output_size, 128)
    if in_p != input_size:
        x = jnp.pad(x, ((0, 0), (0, in_p - input_size)))
        w1 = jnp.pad(w1, ((0, in_p - input_size), (0, 0)))
    if hid_p != hidden_size:
        w1 = jnp.pad(w1, ((0, 0), (0, hid_p - hidden_size)))
        b1 = jnp.pad(b1, ((0, hid_p - hidden_size),))
        w2 = jnp.pad(w2, ((0, hid_p - hidden_size), (0, 0)))
    if out_p != output_size:
        w2 = jnp.pad(w2, ((0, 0), (0, out_p - output_size)))
        b2 = jnp.pad(b2, ((0, out_p - output_size),))

    # ---- batch block size ---------------------------------------------------
    b_pad = _round_up(B, sub)
    if block_b is None:
        if b_pad <= 2 * sub:
            block_b = sub                       # too small to split further
        elif b_pad <= 1024:
            # exactly (at least) 2 grid steps -> both v7x TensorCores get work
            block_b = _round_up((b_pad + 1) // 2, sub)
        else:
            block_b = 512                       # amortize per-step overhead
    block_b = max(sub, min(_round_up(block_b, sub), b_pad))
    b_padded = _round_up(b_pad, block_b)
    if b_padded != B:
        x = jnp.pad(x, ((0, b_padded - B), (0, 0)))

    b1_2d = b1.reshape(1, hid_p)
    b2_2d = b2.reshape(1, out_p)

    # ---- VMEM accounting (weights single-buffered, x/out double-buffered) ---
    w_bytes = (in_p * hid_p) * jnp.dtype(w1.dtype).itemsize \
            + (hid_p * out_p) * jnp.dtype(w2.dtype).itemsize \
            + (hid_p + out_p) * jnp.dtype(b1.dtype).itemsize
    x_blk = block_b * in_p * itemsize
    o_blk = block_b * out_p * itemsize
    h_blk = block_b * hid_p * 4                 # f32 intermediate activation
    need = w_bytes + 2 * x_blk + 2 * o_blk + h_blk
    vmem_limit = min(max(int(need * 3 // 2) + (4 << 20), 32 << 20), 64 << 20)
    # TODO(synk): if single-buffered weights alone exceed ~48 MiB (v7x), switch
    # to a second grid axis tiling hidden_size with a pl.when-managed f32
    # accumulator instead of keeping the whole weights resident.

    cost = pl.CostEstimate(
        flops=flops,
        transcendentals=0,
        bytes_accessed=(b_padded * in_p + in_p * hid_p + hid_p * out_p
                        + hid_p + out_p + b_padded * out_p) * itemsize,
    )

    grid = (b_padded // block_b,)
    resident = dict(pipeline_mode=pl.Buffered(1))  # loaded once, never re-fetched

    out = pl.pallas_call(
        _mlp_kernel,
        out_shape=jax.ShapeDtypeStruct((b_padded, out_p), x.dtype),
        grid_spec=pltpu.PrefetchScalarGridSpec(
            num_scalar_prefetch=0,
            grid=grid,
            in_specs=[
                pl.BlockSpec((block_b, in_p), lambda i: (i, 0)),
                pl.BlockSpec((in_p, hid_p), lambda i: (0, 0), **resident),
                pl.BlockSpec((1, hid_p), lambda i: (0, 0), **resident),
                pl.BlockSpec((hid_p, out_p), lambda i: (0, 0), **resident),
                pl.BlockSpec((1, out_p), lambda i: (0, 0), **resident),
            ],
            out_specs=pl.BlockSpec((block_b, out_p), lambda i: (i, 0)),
        ),
        compiler_params=pltpu.CompilerParams(
            dimension_semantics=("parallel",),
            vmem_limit_bytes=vmem_limit,
        ),
        cost_estimate=cost,
    )(x, w1, b1_2d, w2, b2_2d)

    return out[:B, :output_size]


if __name__ == "__main__":
    key = jax.random.PRNGKey(0)
    k_x, k_w1, k_b1, k_w2, k_b2 = jax.random.split(key, 5)

    # Small shapes consistent with the module's forward (B, in) -> (B, out).
    batch = 64
    input_size = 32
    hidden_size = 64
    output_size = 16

    x = jax.random.normal(k_x, (batch, input_size), dtype=jnp.float32)
    w1 = jax.random.normal(k_w1, (input_size, hidden_size), dtype=jnp.float32) * 0.1
    b1 = jax.random.normal(k_b1, (hidden_size,), dtype=jnp.float32) * 0.1
    w2 = jax.random.normal(k_w2, (hidden_size, output_size), dtype=jnp.float32) * 0.1
    b2 = jax.random.normal(k_b2, (output_size,), dtype=jnp.float32) * 0.1

    out = feed_forward_classifier(x, w1, b1, w2, b2, force_pallas=True)
    out = jax.block_until_ready(out)

    # Pure-JAX reference.
    ref = jnp.maximum(x @ w1 + b1, 0.0) @ w2 + b2
    assert out.shape == (batch, output_size)
    assert jnp.allclose(out, ref, atol=1e-5, rtol=1e-5), "mismatch vs reference"

    print("KERNEL_OK")
</pallas_src>

<mosaic_0001>
module attributes {stable_mosaic.version = 11 : i64} {
  func.func @_mlp_kernel(%arg0: i32, %arg1: memref<32x128xf32, #tpu.memory_space<vmem>>, %arg2: memref<128x128xf32, #tpu.memory_space<vmem>>, %arg3: memref<1x128xf32, #tpu.memory_space<vmem>>, %arg4: memref<128x128xf32, #tpu.memory_space<vmem>>, %arg5: memref<1x128xf32, #tpu.memory_space<vmem>>, %arg6: memref<32x128xf32, #tpu.memory_space<vmem>>) attributes {dimension_semantics = [#tpu.dimension_semantics<parallel>], iteration_bounds = array<i64: 2>, scalar_prefetch = 0 : i64, scratch_operands = 0 : i64, tpu.core_type = #tpu.core_type<tc>, window_params = [{transform_indices = @transform_0, window_bounds = array<i64: 32, 128>}, {pipeline_mode = #tpu.pipeline_mode<synchronous>, transform_indices = @transform_1, window_bounds = array<i64: 128, 128>}, {pipeline_mode = #tpu.pipeline_mode<synchronous>, transform_indices = @transform_2, window_bounds = array<i64: 1, 128>}, {pipeline_mode = #tpu.pipeline_mode<synchronous>, transform_indices = @transform_3, window_bounds = array<i64: 128, 128>}, {pipeline_mode = #tpu.pipeline_mode<synchronous>, transform_indices = @transform_4, window_bounds = array<i64: 1, 128>}, {transform_indices = @transform_5, window_bounds = array<i64: 32, 128>}]} {
    %c0 = arith.constant 0 : index
    %c0_0 = arith.constant 0 : index
    %0 = vector.load %arg1[%c0, %c0_0] : memref<32x128xf32, #tpu.memory_space<vmem>>, vector<32x128xf32>
    %c0_1 = arith.constant 0 : index
    %c0_2 = arith.constant 0 : index
    %1 = vector.load %arg2[%c0_1, %c0_2] : memref<128x128xf32, #tpu.memory_space<vmem>>, vector<128x128xf32>
    %cst = arith.constant dense<0.000000e+00> : vector<32x128xf32>
    %2 = tpu.matmul %0, %1, %cst {dimension_numbers = #tpu.dot_dimension_numbers<[1], [0], [0], [1], [0, 0, 1, 1], [], []>} : vector<32x128xf32>, vector<128x128xf32>, vector<32x128xf32> -> vector<32x128xf32>
    %c0_3 = arith.constant 0 : index
    %c0_4 = arith.constant 0 : index
    %3 = vector.load %arg3[%c0_3, %c0_4] : memref<1x128xf32, #tpu.memory_space<vmem>>, vector<1x128xf32>
    %4 = vector.broadcast %3 : vector<1x128xf32> to vector<32x128xf32>
    %5 = arith.addf %2, %4 : vector<32x128xf32>
    %cst_5 = arith.constant 0.000000e+00 : f32
    %6 = vector.broadcast %cst_5 : f32 to vector<32x128xf32>
    %7 = arith.maximumf %5, %6 : vector<32x128xf32>
    %c0_6 = arith.constant 0 : index
    %c0_7 = arith.constant 0 : index
    %8 = vector.load %arg4[%c0_6, %c0_7] : memref<128x128xf32, #tpu.memory_space<vmem>>, vector<128x128xf32>
    %cst_8 = arith.constant dense<0.000000e+00> : vector<32x128xf32>
    %9 = tpu.matmul %7, %8, %cst_8 {dimension_numbers = #tpu.dot_dimension_numbers<[1], [0], [0], [1], [0, 0, 1, 1], [], []>} : vector<32x128xf32>, vector<128x128xf32>, vector<32x128xf32> -> vector<32x128xf32>
    %c0_9 = arith.constant 0 : index
    %c0_10 = arith.constant 0 : index
    %10 = vector.load %arg5[%c0_9, %c0_10] : memref<1x128xf32, #tpu.memory_space<vmem>>, vector<1x128xf32>
    %11 = vector.broadcast %10 : vector<1x128xf32> to vector<32x128xf32>
    %12 = arith.addf %9, %11 : vector<32x128xf32>
    %c0_11 = arith.constant 0 : index
    %c0_12 = arith.constant 0 : index
    %13 = vector.load %arg6[%c0_11, %c0_12] : memref<32x128xf32, #tpu.memory_space<vmem>>, vector<32x128xf32>
    tpu.vector_store %arg6[%c0_11, %c0_12], %12 {strides = array<i32>} : memref<32x128xf32, #tpu.memory_space<vmem>>, vector<32x128xf32>,
    return
  }
  func.func @transform_0(%arg0: i32) -> (i32, i32) {
    %c0_i32 = arith.constant 0 : i32
    %c0_i32_0 = arith.constant 0 : i32
    return %arg0, %c0_i32 : i32, i32
  }
  func.func @transform_1(%arg0: i32) -> (i32, i32) {
    %c0_i32 = arith.constant 0 : i32
    %c0_i32_0 = arith.constant 0 : i32
    %c0_i32_1 = arith.constant 0 : i32
    return %c0_i32, %c0_i32_0 : i32, i32
  }
  func.func @transform_2(%arg0: i32) -> (i32, i32) {
    %c0_i32 = arith.constant 0 : i32
    %c0_i32_0 = arith.constant 0 : i32
    %c0_i32_1 = arith.constant 0 : i32
    return %c0_i32, %c0_i32_0 : i32, i32
  }
  func.func @transform_3(%arg0: i32) -> (i32, i32) {
    %c0_i32 = arith.constant 0 : i32
    %c0_i32_0 = arith.constant 0 : i32
    %c0_i32_1 = arith.constant 0 : i32
    return %c0_i32, %c0_i32_0 : i32, i32
  }
  func.func @transform_4(%arg0: i32) -> (i32, i32) {
    %c0_i32 = arith.constant 0 : i32
    %c0_i32_0 = arith.constant 0 : i32
    %c0_i32_1 = arith.constant 0 : i32
    return %c0_i32, %c0_i32_0 : i32, i32
  }
  func.func @transform_5(%arg0: i32) -> (i32, i32) {
    %c0_i32 = arith.constant 0 : i32
    %c0_i32_0 = arith.constant 0 : i32
    return %arg0, %c0_i32 : i32, i32
  }
}

</mosaic_0001>

<bundles_post_ra>
// kernel: tpu_custom_call.1
= control target key start
LH: loop header
LB: loop body
LE: loop exit
PB: predicated region body
PF: predicated region fallthrough
CT: control target
= control target key end

     0   :  { %10 = vsyncpa [#allocation3], 0  ;;  %s1336_s0 = inlined_call_operand.hbm [shape: f32[64,128], index: 0, kind: input, shape index: {}]   ;;  %s1337_s1 = inlined_call_operand.hbm [shape: f32[128,128], index: 1, kind: input, shape index: {}]   ;;  %s1338_s2 = inlined_call_operand.vmem [shape: f32[1,128], index: 2, kind: input, shape index: {}]   ;;  %s1339_s3 = inlined_call_operand.hbm [shape: f32[128,128], index: 3, kind: input, shape index: {}]   ;;  %s1340_s4 = inlined_call_operand.vmem [shape: f32[1,128], index: 4, kind: input, shape index: {}]   ;;  %s1341_s5 = inlined_call_operand.hbm [shape: f32[64,128], index: 5, kind: output, shape index: {}]  }
   0x1   :  { %12 = vsyncpa [#allocation3 + $0x1], 0 }
   0x2   :  { %13 = vsyncpa [#allocation6], 0 }
   0x3   :  { %14 = vsyncpa [#allocation4], 0 }
   0x4   :  { %16 = vsyncpa [#allocation4 + $0x1], 0  ;;  %s1077_s18 = smov 0   ;;  %s1079_s19 = smov 0  }
   0x5   :  { %s1081_s20 = smov 0   ;;  %s1083_s21 = smov 0  }
   0x6 LB: > { %s1098_s22 = sadd.s32 4294967295, %s1037_s21   ;;  %s608_s23 = sadd.s32 4294967294, %s1037_s21   ;;  %s1037_s21 = sphi %s1083_s21, %s1361_s21   ;;  %s1033_s20 = sphi %s1081_s20, %s1360_s20   ;;  %s1029_s19 = sphi %s1079_s19, %s1359_s19   ;;  %s1025_s18 = sphi %s1077_s18, %s1358_s18  }
   0x7   : > { %p42_p0 = scmp.ne.s32.totalorder %s1029_s19, %s1025_s18  ;;  %p1342_p1 = scmp.eq.s32.totalorder %s1098_s22, 0 }
   0x8   : > { %p156_p3 = scmp.eq.s32.totalorder %s608_s23, 1  ;;  %p609_p5 = scmp.ge.s32.totalorder %s1037_s21, 1 }
   0x9   : > { %p1107_p4 = por %p1342_p1, %p42_p0  ;;  %p163_p7 = scmp.lt.s32.totalorder %s1037_s21, 3 }
   0xa   : > { %p1112_p6 = por %p156_p3, %p42_p0  ;;  %s1039_s27 = smov [#allocation5]  }
   0xb   : > { %s1345_s24 = scalar_select %p1107_p4, 1, 0 }
   0xc   : > { %s1346_s25 = scalar_select %p1112_p6, 1, 0 }
   0xd   : > { %p1117_p8 = pnand %p609_p5, %p163_p7  ;;  %s175_s28 = sshll.u32 %s1039_s27, 4  ;;  %s1121_s28 = int_to_ptr.vmem [resolvable:$true] %s175_s28 }
   0xe   : > { %s1040_s30 = smov [#allocation7]   ;;  %s881_s9 = scalar_lea.hbm %s1337_s1, 2048 }
   0xf   : > { %p822_p9 = pneg %p1117_p8  ;;  %s191_s6 = sshll.u32 %s1040_s30, 4  ;;  %s1132_s6 = int_to_ptr.vmem [resolvable:$true] %s191_s6 }
  0x10   : > { %p882_p12 = scmp.ne.s32.totalorder %s1337_s1, %s881_s9  ;;  %p888_p5 = scmp.lt.u32.totalorder %s881_s9, %s1337_s1 }
  0x11   : > { %p1128_p11 = pnand %p822_p9, %p1342_p1 }
  0x13   : > { %p883_p13 = pneg %p1128_p11 }
  0x15   : > { %p884_p0 = pnand %p883_p13, %p882_p12 }
  0x17   : > { %p885_p3 = pneg %p884_p0 }
  0x19   : > { %p890_p7 = pnand %p888_p5, %p885_p3 }
  0x1b   : > { %893 = shalt.err (!%p890_p7)
}
  0x1c   : > { %s894_s14 = scalar_lea.vmem %s1121_s28, 2048  ;;  %p902_p2 = scmp.lt.s32.totalorder %s1121_s28, %s1121_s28 }
  0x1d   : > { %p895_p9 = scmp.ne.s32.totalorder %s1121_s28, %s894_s14  ;;  %p903_p12 = scmp.lt.s32.totalorder %s894_s14, %s894_s14 }
  0x1f   : > { %p897_p10 = pnand %p895_p9, %p883_p13  ;;  %p904_p0 = por %p903_p12, %p902_p2 }
  0x21   : > { %p898_p1 = pneg %p897_p10 }
  0x23   : > { %p905_p6 = pnand %p904_p0, %p898_p1 }
  0x25   : > { %908 = shalt.err (!%p905_p6)
}
  0x26   : > { %s1041_s15 = smov 128   ;;  %s1042_s16 = smov 8  }
  0x27   : > { %825 = dma.hbm_to_vmem [thread:$0]  (!%p1128_p11), %s1337_s1, 2048, %s1121_s28, [#allocation6], %s1041_s15, %s1041_s15, %s1042_s16  }
  0x28   : > { %s909_s7 = scalar_lea.hbm %s1339_s3, 2048 }
  0x29   : > { %p910_p1 = scmp.ne.s32.totalorder %s1339_s3, %s909_s7  ;;  %p916_p10 = scmp.lt.u32.totalorder %s909_s7, %s1339_s3 }
  0x2b   : > { %p912_p2 = pnand %p910_p1, %p883_p13 }
  0x2d   : > { %p913_p6 = pneg %p912_p2 }
  0x2f   : > { %p918_p3 = pnand %p916_p10, %p913_p6 }
  0x31   : > { %921 = shalt.err (!%p918_p3)
}
  0x32   : > { %s922_s28 = scalar_lea.vmem %s1132_s6, 2048  ;;  %p930_p12 = scmp.lt.s32.totalorder %s1132_s6, %s1132_s6 }
  0x33   : > { %p923_p5 = scmp.ne.s32.totalorder %s1132_s6, %s922_s28  ;;  %p931_p0 = scmp.lt.s32.totalorder %s922_s28, %s922_s28 }
  0x35   : > { %p925_p7 = pnand %p923_p5, %p883_p13  ;;  %p932_p1 = por %p931_p0, %p930_p12 }
  0x37   : > { %p926_p9 = pneg %p925_p7 }
  0x39   : > { %p933_p2 = pnand %p932_p1, %p926_p9 }
  0x3b   : > { %936 = shalt.err (!%p933_p2)
}
  0x3c   : > { %828 = dma.hbm_to_vmem [thread:$0]  (!%p1128_p11), %s1339_s3, 2048, %s1132_s6, [#allocation6], %s1041_s15, %s1041_s15, %s1042_s16  }
  0x3d   : > { %s1193_s29 = sadd.s32 1, %s1037_s21   ;;  %s29_s14 = sadd.s32 1, %s1033_s20 }
  0x3e   : > { %s26_s17 = ssub.s32 %s1037_s21, %s1193_s29  ;;  %p36_p13 = scmp.ne.s32.totalorder %s1033_s20, %s1029_s19 }
  0x3f   : > { %p27_p6 = scmp.eq.s32.totalorder %s26_s17, 0  ;;  %p37_p10 = scmp.eq.s32.totalorder %s1037_s21, 0 }
  0x40   : > { %p1349_p3 = scmp.eq.s32.totalorder %s1098_s22, 1  ;;  %p839_p7 = scmp.lt.s32.totalorder %s1037_s21, 2 }
  0x41   : > { %s1209_s27 = scalar_select %p27_p6, %s1033_s20, %s29_s14  }
  0x42   : > { %p1203_p5 = por %p1349_p3, %p36_p13  ;;  %p38_p9 = por %p37_p10, %p36_p13 }
  0x43   : > { %s208_s30 = sand.u32 1, %s1033_s20   ;;  %s628_s6 = sshll.u32 %s1037_s21, 9 }
  0x44   : > { %s1350_s23 = scalar_select %p1203_p5, 1, 0 }
  0x45   : > { %s613_s7 = sshll.u32 %s208_s30, 5  ;;  %s1216_s10 = scalar_lea.hbm %s1336_s0, %s628_s6 }
  0x46   : > { %s212_s11 = scalar_lea.vmem [#allocation2], %s613_s7  ;;  %p1220_p11 = pnand %p839_p7, %p38_p9 }
  0x47   : > { %s219_s28 = sshll.u32 %s212_s11, 4  ;;  %s1224_s13 = scalar_lea.sflag [#allocation3], %s208_s30  ;;  %s1218_s28 = int_to_ptr.vmem [resolvable:$true] %s219_s28 }
  0x48   : > { %s937_s14 = scalar_lea.hbm %s1216_s10, 512  ;;  %p939_p0 = pneg %p1220_p11 }
  0x49   : > { %p938_p12 = scmp.ne.s32.totalorder %s1216_s10, %s937_s14  ;;  %s942_s6 = scalar_lea.hbm %s1336_s0, 1024 }
  0x4a   : > { %p943_p13 = scmp.lt.u32.totalorder %s1216_s10, %s1336_s0  ;;  %p944_p6 = scmp.lt.u32.totalorder %s942_s6, %s937_s14 }
  0x4b   : > { %p940_p1 = pnand %p939_p0, %p938_p12  ;;  %p946_p3 = scmp.lt.u32.totalorder %s937_s14, %s1216_s10 }
  0x4c   : > { %p945_p10 = por %p944_p6, %p943_p13 }
  0x4d   : > { %p941_p2 = pneg %p940_p1 }
  0x4e   : > { %p947_p7 = por %p946_p3, %p945_p10 }
  0x50   : > { %p948_p9 = pnand %p947_p7, %p941_p2 }
  0x52   : > { %951 = shalt.err (!%p948_p9)
}
  0x53   : > { %s952_s30 = scalar_lea.vmem %s1218_s28, 512  ;;  %s1043_s11 = smov [#allocation2]  }
  0x54   : > { %p953_p12 = scmp.ne.s32.totalorder %s1218_s28, %s952_s30  ;;  %s957_s17 = sshll.u32 %s1043_s11, 4  ;;  %s958_s17 = int_to_ptr.vmem [resolvable:$false] %s957_s17 }
  0x55   : > { %s959_s7 = scalar_lea.vmem %s958_s17, 1024  ;;  %p960_p4 = scmp.lt.s32.totalorder %s1218_s28, %s958_s17 }
  0x56   : > { %p955_p1 = pnand %p953_p12, %p939_p0  ;;  %p961_p13 = scmp.lt.s32.totalorder %s959_s7, %s952_s30 }
  0x58   : > { %p956_p5 = pneg %p955_p1  ;;  %p962_p6 = por %p961_p13, %p960_p4 }
  0x5a   : > { %p963_p10 = pnand %p962_p6, %p956_p5 }
  0x5c   : > { %966 = shalt.err (!%p963_p10)
}
  0x5d   : > { %832 = dma.hbm_to_vmem [thread:$0]  (!%p1220_p11), %s1216_s10, 512, %s1218_s28, %s1224_s13, %s1041_s15, %s1041_s15, %s1042_s16  }
  0x5e   : > { %231 = sbr.rel (%p1117_p8) target bundleno = 592 (0x250), region = 40  ;;  %s1258_s14 = sand.u32 (!%p1117_p8), 1, %s1029_s19  }
  0x5f   : > { %s617_s6 = sshll.u32 (!%p1117_p8), %s1258_s14, 5  ;;  %s234_s8 = scalar_lea.sflag (!%p1117_p8), [#allocation3], %s1258_s14 }
  0x60   : > { %s1264_s12 = scalar_lea.vmem (!%p1117_p8), [#allocation2], %s617_s6  ;;  %p1352_p4 = scmp.ne.s32.totalorder (!%p1117_p8), %s1345_s24, 0 }
  0x65   : > { %1012 = dma.done.wait (%p1352_p4), %s234_s8, 512  }
  0x66   : > { %1014 = vsyncadd (%p1352_p4), %s234_s8, 4294966784  ;;  %p1353_p5 = scmp.eq.s32.totalorder %s1098_s22, 0 }
  0x68   : > { %1016 = dma.done.wait (%p1353_p5), [#allocation6], 4096   ;;  %p1354_p8 = pmov %p1353_p5 }
  0x69   : > { %v278_v0 = vld [vmem:[#allocation5] sm:$0xff]  ;;  %v279_v1 = vld [vmem:[#allocation5 + $0x8] sm:$0xff]  ;;  %v280_v2 = vld [vmem:[#allocation5 + $0x10] sm:$0xff]  ;;  %s271_s10 = scalar_lea.vmem [#allocation8], %s617_s6  ;;  %s629_s13 = sshll.u32 %s1098_s22, 9 }
  0x6a   : > { %1018 = vsyncadd (%p1354_p8), [#allocation6], 4294963200  ;;  %v746_v3 = vpack.c.bf16 %v279_v1, %v278_v0  ;;  %v281_v4 = vld [vmem:[#allocation5 + $0x18] sm:$0xff]  ;;  %v282_v6 = vld [vmem:[#allocation5 + $0x20] sm:$0xff]  ;;  %s516_s28 = sshll.u32 %s271_s10, 4  ;;  %s1292_s11 = scalar_lea.hbm %s1341_s5, %s629_s13  ;;  %s1287_s28 = int_to_ptr.vmem [resolvable:$true] %s516_s28 }
  0x6b   : > { %v750_v5 = vpack.c.bf16 %v281_v4, %v280_v2  ;;  %v283_v7 = vld [vmem:[#allocation5 + $0x28] sm:$0xff]  ;;  %v274_v9 = vld [vmem:[%s1264_s12] sm:$0xff]  ;;  %v284_v10 = vld [vmem:[#allocation5 + $0x30] sm:$0xff]  ;;  %s503_s17 = scalar_lea.sflag [#allocation4], %s1258_s14  ;;  %s967_s22 = scalar_lea.vmem %s1287_s28, 512 }
  0x6c   : > { %747 = vmatprep.subr.bf16.mxu0 %v746_v3  ;;  %v754_v8 = vpack.c.bf16 %v283_v7, %v282_v6  ;;  %v285_v11 = vld [vmem:[#allocation5 + $0x38] sm:$0xff]  ;;  %702 = vmatprep.mubr.f32.mxu0 %v274_v9  ;;  %v390_v12 = vld [vmem:[#allocation7] sm:$0xff]  ;;  %v391_v13 = vld [vmem:[#allocation7 + $0x8] sm:$0xff]  ;;  %p968_p11 = scmp.ne.s32.totalorder %s1287_s28, %s967_s22  ;;  %p1355_p0 = scmp.ne.s32.totalorder %s1350_s23, 0 }
  0x6d   : > { %749 = vmatpush3.bf16.msra.mxu0 %v746_v3  ;;  %v392_v14 = vld [vmem:[#allocation7 + $0x10] sm:$0xff]  ;;  %v393_v15 = vld [vmem:[#allocation7 + $0x18] sm:$0xff]  ;;  %v778_v16 = vpack.c.bf16 %v391_v13, %v390_v12  ;;  %v758_v18 = vpack.c.bf16 %v285_v11, %v284_v10  ;;  %v394_v19 = vld [vmem:[#allocation7 + $0x20] sm:$0xff]  ;;  %s1044_s7 = smov [#allocation8]  }
  0x6e   : > { %751 = vmatprep.subr.bf16.mxu0 %v750_v5  ;;  %v782_v17 = vpack.c.bf16 %v393_v15, %v392_v14  ;;  %v395_v20 = vld [vmem:[#allocation7 + $0x28] sm:$0xff]  ;;  %v286_v21 = vld [vmem:[#allocation5 + $0x40] sm:$0xff]  ;;  %v396_v25 = vld [vmem:[#allocation7 + $0x30] sm:$0xff]  ;;  %p969_p2 = pnand %p968_p11, %p1355_p0  ;;  %s971_s6 = sshll.u32 %s1044_s7, 4  ;;  %s972_s6 = int_to_ptr.vmem [resolvable:$false] %s971_s6 }
  0x6f   : > { %v287_v22 = vld [vmem:[#allocation5 + $0x48] sm:$0xff]  ;;  %779 = vmatprep.subr.bf16.mxu1 %v778_v16  ;;  %v786_v23 = vpack.c.bf16 %v395_v20, %v394_v19  ;;  %v397_v26 = vld [vmem:[#allocation7 + $0x38] sm:$0xff]  ;;  %v288_v27 = vld [vmem:[#allocation5 + $0x50] sm:$0xff]  ;;  %s973_s8 = scalar_lea.vmem %s972_s6, 1024  ;;  %p974_p7 = scmp.lt.s32.totalorder %s1287_s28, %s972_s6 }
  0x70   : > { %781 = vmatpush3.bf16.msra.mxu1 %v778_v16  ;;  %v762_v24 = vpack.c.bf16 %v287_v22, %v286_v21  ;;  %v289_v28 = vld [vmem:[#allocation5 + $0x58] sm:$0xff]  ;;  %v790_v29 = vpack.c.bf16 %v397_v26, %v396_v25  ;;  %v398_v31 = vld [vmem:[#allocation7 + $0x40] sm:$0xff]  ;;  %v399_v32 = vld [vmem:[#allocation7 + $0x48] sm:$0xff]  ;;  %p970_p3 = pneg %p969_p2  ;;  %p975_p9 = scmp.lt.s32.totalorder %s973_s8, %s967_s22 }
  0x71   : > { %753 = vmatpush3.bf16.msra.mxu0 %v750_v5  ;;  %783 = vmatprep.subr.bf16.mxu1 %v782_v17  ;;  %v766_v30 = vpack.c.bf16 %v289_v28, %v288_v27  ;;  %v290_v33 = vld [vmem:[#allocation5 + $0x60] sm:$0xff]  ;;  %v291_v34 = vld [vmem:[#allocation5 + $0x68] sm:$0xff]  ;;  %v794_v35 = vpack.c.bf16 %v399_v32, %v398_v31  ;;  %v400_v37 = vld [vmem:[#allocation7 + $0x50] sm:$0xff] }
  0x72   : > { %755 = vmatprep.subr.bf16.mxu0 %v754_v8  ;;  %v770_v36 = vpack.c.bf16 %v291_v34, %v290_v33  ;;  %v401_v38 = vld [vmem:[#allocation7 + $0x58] sm:$0xff]  ;;  %v292_v39 = vld [vmem:[#allocation5 + $0x70] sm:$0xff]  ;;  %v402_v43 = vld [vmem:[#allocation7 + $0x60] sm:$0xff]  ;;  %p976_p12 = por %p975_p9, %p974_p7 }
  0x73   : > { %v293_v40 = vld [vmem:[#allocation5 + $0x78] sm:$0xff]  ;;  %v798_v41 = vpack.c.bf16 %v401_v38, %v400_v37  ;;  %v403_v44 = vld [vmem:[#allocation7 + $0x68] sm:$0xff]  ;;  %v276_v47 = vld [vmem:[%s1264_s12 + $0x10] sm:$0xff] }
  0x74   : > { %785 = vmatpush3.bf16.msra.mxu1 %v782_v17  ;;  %v774_v42 = vpack.c.bf16 %v293_v40, %v292_v39  ;;  %v802_v45 = vpack.c.bf16 %v403_v44, %v402_v43  ;;  %v275_v46 = vld [vmem:[%s1264_s12 + $0x8] sm:$0xff]  ;;  %v277_v48 = vld [vmem:[%s1264_s12 + $0x18] sm:$0xff]  ;;  %v404_v49 = vld [vmem:[#allocation7 + $0x70] sm:$0xff]  ;;  %p977_p1 = pnand %p976_p12, %p970_p3 }
  0x75   : > { %757 = vmatpush3.bf16.msra.mxu0 %v754_v8  ;;  %787 = vmatprep.subr.bf16.mxu1 %v786_v23  ;;  %v405_v50 = vld [vmem:[#allocation7 + $0x78] sm:$0xff]  ;;  %v621_v52 = vld [vmem:[%s1338_s2] ss:$0 sm:$0xff] }
  0x76   : > { %759 = vmatprep.subr.bf16.mxu0 %v758_v18  ;;  %v806_v51 = vpack.c.bf16 %v405_v50, %v404_v49  ;;  %v622_v1 = vld [vmem:[%s1340_s4] ss:$0 sm:$0xff] }
  0x78   : > { %789 = vmatpush3.bf16.msra.mxu1 %v786_v23 }
  0x79   : > { %761 = vmatpush3.bf16.msra.mxu0 %v758_v18  ;;  %791 = vmatprep.subr.bf16.mxu1 %v790_v29 }
  0x7a   : > { %763 = vmatprep.subr.bf16.mxu0 %v762_v24 }
  0x7c   : > { %793 = vmatpush3.bf16.msra.mxu1 %v790_v29 }
  0x7d   : > { %765 = vmatpush3.bf16.msra.mxu0 %v762_v24  ;;  %795 = vmatprep.subr.bf16.mxu1 %v794_v35 }
  0x7e   : > { %767 = vmatprep.subr.bf16.mxu0 %v766_v30 }
  0x80   : > { %797 = vmatpush3.bf16.msra.mxu1 %v794_v35 }
  0x81   : > { %769 = vmatpush3.bf16.msra.mxu0 %v766_v30  ;;  %799 = vmatprep.subr.bf16.mxu1 %v798_v41 }
  0x82   : > { %771 = vmatprep.subr.bf16.mxu0 %v770_v36 }
  0x84   : > { %801 = vmatpush3.bf16.msra.mxu1 %v798_v41 }
  0x85   : > { %773 = vmatpush3.bf16.msra.mxu0 %v770_v36  ;;  %803 = vmatprep.subr.bf16.mxu1 %v802_v45 }
  0x86   : > { %775 = vmatprep.subr.bf16.mxu0 %v774_v42 }
  0x88   : > { %805 = vmatpush3.bf16.msra.mxu1 %v802_v45 }
  0x89   : > { %777 = vmatpush3.bf16.msra.mxu0 %v774_v42  ;;  %807 = vmatprep.subr.bf16.mxu1 %v806_v51 }
  0x8c   : > { %703 = vmatmul.mubr.f32.vlgmr.msra.gmra.mrb[0].mxu0 %v275_v46  ;;  %809 = vmatpush3.bf16.msra.mxu1 %v806_v51 }
  0x8d   : > { %705 = vmatprep.mubr.f32.mxu0 %v276_v47 }
  0x90   : > { %706 = vmatmul.mubr.f32.gmra.mrb[2].mxu0 %v277_v48 }
 0x15f   : > { %v704_v53 = vpop.f32.mrb[0].mxu0 }
 0x160   : > { %v373_v54 = vadd.f32 %v704_v53, %v621_v52  ;;  %v367_v55 = vpop.f32.mrb[1].mxu0 }
 0x161   : > { %v368_v56 = vadd.f32 %v621_v52, %v367_v55 }
 0x162   : > { %v387_v59 = vmax.f32 %v373_v54, 0.0 }
 0x163   : > { %v707_v57 = vpop.f32.mrb[2].mxu0  ;;  %v386_v58 = vmax.f32 %v368_v56, 0.0 }
 0x164   : > { %v383_v60 = vadd.f32 %v707_v57, %v621_v52  ;;  %v377_v61 = vpop.f32.mrb[3].mxu0 }
 0x165   : > { %v378_v62 = vadd.f32 %v621_v52, %v377_v61  ;;  %740 = vmatprep.mubr.f32.mxu1 %v386_v58 }
 0x166   : > { %741 = vmatmul.mubr.f32.vlgmr.msra.gmra.mrb[0].mxu1 %v387_v59  ;;  %v389_v0 = vmax.f32 %v383_v60, 0.0 }
 0x167   : > { %v388_v63 = vmax.f32 %v378_v62, 0.0 }
 0x169   : > { %743 = vmatprep.mubr.f32.mxu1 %v388_v63 }
 0x16a   : > { %744 = vmatmul.mubr.f32.gmra.mrb[2].mxu1 %v389_v0 }
 0x239   : > { %v742_v2 = vpop.f32.mrb[0].mxu1 }
 0x23a   : > { %v485_v3 = vadd.f32 %v742_v2, %v622_v1  ;;  %v479_v4 = vpop.f32.mrb[1].mxu1 }
 0x23b   : > { %v480_v5 = vadd.f32 %v622_v1, %v479_v4 }
 0x23c   : > { %499 = vst [vmem:[%s271_s10 + $0x8] sm:$0xff] %v485_v3 }
 0x23d   : > { %498 = vst [vmem:[%s271_s10] sm:$0xff] %v480_v5  ;;  %v745_v6 = vpop.f32.mrb[2].mxu1 }
 0x23e   : > { %v495_v7 = vadd.f32 %v745_v6, %v622_v1  ;;  %v489_v8 = vpop.f32.mrb[3].mxu1 }
 0x23f   : > { %v490_v9 = vadd.f32 %v622_v1, %v489_v8 }
 0x240   : > { %501 = vst [vmem:[%s271_s10 + $0x18] sm:$0xff] %v495_v7 }
 0x241   : > { %500 = vst [vmem:[%s271_s10 + $0x10] sm:$0xff] %v490_v9 }
 0x242   : > { %980 = shalt.err (!%p977_p1)
}
 0x243   : > { %s981_s12 = scalar_lea.hbm %s1292_s11, 512  ;;  %s985_s15 = scalar_lea.hbm %s1341_s5, 1024 }
 0x244   : > { %p982_p13 = scmp.ne.s32.totalorder %s1292_s11, %s981_s12  ;;  %p986_p4 = scmp.lt.u32.totalorder %s1292_s11, %s1341_s5 }
 0x245   : > { %p987_p5 = scmp.lt.u32.totalorder %s985_s15, %s981_s12  ;;  %p989_p11 = scmp.lt.u32.totalorder %s981_s12, %s1292_s11 }
 0x246   : > { %p983_p6 = pnand %p982_p13, %p1355_p0 }
 0x247   : > { %p988_p8 = por %p987_p5, %p986_p4 }
 0x248   : > { %p984_p10 = pneg %p983_p6 }
 0x249   : > { %p990_p2 = por %p989_p11, %p988_p8 }
 0x24b   : > { %p991_p3 = pnand %p990_p2, %p984_p10 }
 0x24d   : > { %994 = shalt.err (!%p991_p3)
}
 0x24e   : > { %s1045_s13 = smov 128   ;;  %s1046_s9 = smov 8  }
 0x24f   : > { %820 = dma.vmem_to_hbm [thread:$0]  (%p1355_p0), %s1287_s28, 512, %s1292_s11, %s503_s17, %s1045_s13, %s1045_s13, %s1046_s9  }
 0x250 PF: > { %s531_s30 = sand.u32 1, %s1025_s18   ;;  %p1356_p7 = scmp.ne.s32.totalorder %s1346_s25, 0 }
 0x251   : > { %p1357_p9 = scmp.ge.s32.totalorder %s1037_s21, 2  ;;  %s532_s22 = scalar_lea.sflag [#allocation4], %s531_s30 }
 0x253   : > { %p834_p12 = pnand %p1357_p9, %p1356_p7 }
 0x255   : > { %1020 = dma.done.wait (!%p834_p12), %s532_s22, 512  }
 0x256   : > { %1022 = vsyncadd (!%p834_p12), %s532_s22, 4294966784  ;;  %p19_p1 = scmp.ge.s32.totalorder %s1193_s29, 4   ;;  %s1358_s18 = smov %s1029_s19 }
 0x257   : > { %s1359_s19 = smov %s1033_s20  ;;  %s1360_s20 = smov %s1209_s27 }
 0x258   : > { %s1361_s21 = smov %s1193_s29  ;;  %21 = sbr.rel (!%p19_p1) target bundleno = 6 (0x6), region = 93 }
 0x25f   :  { %537 = vsyncpa [#allocation3], 1 }
 0x260   :  { %539 = vsyncpa [#allocation3 + $0x1], 1 }
 0x261   :  { %540 = vsyncpa [#allocation6], 1 }
 0x262   :  { %541 = vsyncpa [#allocation4], 1 }
 0x263   :  { %543 = vsyncpa [#allocation4 + $0x1], 1 }

</bundles_post_ra>
